<compile_context>
chip_gen: v6e
topology: v6e:2x2x1
jax: 0.10.0
libtpu: 0.0.40
codegen_flags: <defaults>
</compile_context>

<pallas_src>
import jax
import jax.numpy as jnp
from jax import lax
from jax.experimental import pallas as pl
from jax.experimental.pallas import tpu as pltpu


def _round_up(a: int, b: int) -> int:
    return -(-a // b) * b


def _vmem_capacity_bytes() -> int:
    """Physical VMEM of the local TPU; conservative 64 MiB (v7x) fallback."""
    try:
        return int(pltpu.get_tpu_info().vmem_capacity_bytes)
    except Exception:
        return 64 << 20


def _block_spec(block_shape, index_map, *, extra_buffering=False):
    """BlockSpec with an optional 3-deep pipeline for small per-step tiles."""
    if extra_buffering and hasattr(pl, "Buffered"):
        try:
            return pl.BlockSpec(block_shape, index_map, pipeline_mode=pl.Buffered(3))
        except TypeError:
            pass
    return pl.BlockSpec(block_shape, index_map)


def _plan_tiles(nc, hw, itemsize, vmem_cap, target_tile_bytes, max_tile_bytes):
    """Choose (row_tile, hw_tile, needs_hw_tiling)."""
    hw_pad = _round_up(hw, 128)
    min_rows = 8 * max(1, 4 // itemsize)  # f32 -> 8, bf16 -> 16, int8/fp8 -> 32
    align = min_rows if nc >= min_rows else 8
    row_cap = _round_up(nc, align)

    vmem_budget = (vmem_cap * 3) // 4              # leave headroom for Mosaic scratch
    per_buf_budget = max(1 << 20, (vmem_budget - (4 << 20)) // 2)  # double-buffered
    if max_tile_bytes is not None:
        per_buf_budget = max(64 << 10, min(per_buf_budget, int(max_tile_bytes)))
    if target_tile_bytes is None:
        target_tile_bytes = (24 << 20) if vmem_cap >= (96 << 20) else (14 << 20)
    target_tile_bytes = max(64 << 10, int(target_tile_bytes))

    if align * hw_pad * itemsize <= per_buf_budget:
        # ---- Case A: rows-only grid; full H*W reduced inside each step. ----
        want_rows = max(align, target_tile_bytes // max(1, hw * itemsize))  # logical
        max_rows = max(align, per_buf_budget // (hw_pad * itemsize))        # padded
        tr = min(want_rows, max_rows, row_cap)
        # Keep >= ~4 grid steps when there are enough rows (both v7x TCs + overlap).
        if nc >= 4 * align:
            tr = min(tr, _round_up(-(-nc // 4), align))
        elif nc >= 2 * align:
            tr = min(tr, _round_up(-(-nc // 2), align))
        if tr >= 128:
            tr = (tr // 128) * 128      # lane-dense (1, tr) output stores
        else:
            tr = _round_up(tr, align)
        tr = max(align, min(tr, row_cap))
        return tr, hw, False

    # ---- Case B: huge spatial extent; tile H*W with an f32 accumulator. ----
    tr = align
    thw = (per_buf_budget // (tr * itemsize)) // 128 * 128
    thw = max(128, thw)
    if thw >= hw:
        return tr, hw, False
    return tr, thw, True


def global_avg_pool2d(x, keepdim: bool = False, *,
                      target_tile_bytes=None, max_tile_bytes=None):
    """Pallas TPU implementation of GlobalAvgPool2d.forward (NCHW input)."""
    n, c, h, w = x.shape
    nc = n * c
    hw = h * w
    itemsize = jnp.dtype(x.dtype).itemsize

    # Free view for contiguous NCHW: rows = (n, c) pairs, lane-dense H*W last.
    x2 = x.reshape(nc, hw)

    vmem_cap = _vmem_capacity_bytes()
    vmem_budget = (vmem_cap * 3) // 4
    tr, thw, tile_hw = _plan_tiles(nc, hw, itemsize, vmem_cap,
                                   target_tile_bytes, max_tile_bytes)
    g_rows = -(-nc // tr)
    inv_hw = 1.0 / float(hw)

    tile_pad_bytes = tr * _round_up(thw, 128) * itemsize
    out_buf_bytes = 2 * 8 * _round_up(tr, 128) * itemsize
    cost = pl.CostEstimate(
        flops=int(nc) * int(hw),
        transcendentals=0,
        bytes_accessed=int(nc) * int(hw) * itemsize + int(nc) * itemsize,
    )

    if not tile_hw:
        # ---------------- rows-only grid, full-HW reduce per step ----------------
        extra = (tile_pad_bytes < (2 << 20)) and (g_rows >= 4)
        n_buf = 3 if extra else 2
        vmem_limit = int(min(vmem_budget,
                             max(16 << 20,
                                 n_buf * tile_pad_bytes + out_buf_bytes + (4 << 20))))

        def kernel(x_ref, o_ref):
            # f32 accumulation without materializing a widened tile copy;
            # multiply by a precomputed reciprocal instead of dividing.
            s = jnp.sum(x_ref[...], axis=-1, dtype=jnp.float32)
            o_ref[...] = (s * inv_hw).astype(o_ref.dtype)[None, :]

        out = pl.pallas_call(
            kernel,
            out_shape=jax.ShapeDtypeStruct((g_rows, tr), x.dtype),
            grid=(g_rows,),
            in_specs=[_block_spec((tr, hw), lambda i: (i, 0), extra_buffering=extra)],
            out_specs=pl.BlockSpec((1, tr), lambda i: (i, 0)),
            compiler_params=pltpu.CompilerParams(
                dimension_semantics=("parallel",),
                vmem_limit_bytes=vmem_limit,
            ),
            cost_estimate=cost,
        )(x2)
    else:
        # -------- 2-D grid: rows (parallel) x hw-chunks (arbitrary, reduced) -----
        g_hw = -(-hw // thw)
        needs_mask = (hw % thw) != 0
        vmem_limit = int(min(vmem_budget,
                             max(16 << 20,
                                 2 * tile_pad_bytes + out_buf_bytes + (4 << 20))))

        def kernel(x_ref, o_ref, acc_ref):
            k = pl.program_id(1)

            @pl.when(k == 0)
            def _():
                acc_ref[...] = jnp.zeros_like(acc_ref)

            xblk = x_ref[...]
            if needs_mask:
                # Zero out-of-bounds columns of the last HW chunk before summing.
                col = lax.broadcasted_iota(jnp.int32, xblk.shape, 1) + k * thw
                xblk = jnp.where(col < hw, xblk, jnp.zeros_like(xblk))
            acc_ref[...] += jnp.sum(xblk, axis=-1, dtype=jnp.float32)[:, None]

            @pl.when(k == pl.num_programs(1) - 1)
            def _():
                acc = acc_ref[...]
                o_ref[...] = (acc[:, 0] * inv_hw).astype(o_ref.dtype)[None, :]

        out = pl.pallas_call(
            kernel,
            out_shape=jax.ShapeDtypeStruct((g_rows, tr), x.dtype),
            grid=(g_rows, g_hw),
            in_specs=[pl.BlockSpec((tr, thw), lambda i, k: (i, k))],
            out_specs=pl.BlockSpec((1, tr), lambda i, k: (i, 0)),
            scratch_shapes=[pltpu.VMEM((tr, 1), jnp.float32)],
            compiler_params=pltpu.CompilerParams(
                dimension_semantics=("parallel", "arbitrary"),
                vmem_limit_bytes=vmem_limit,
            ),
            cost_estimate=cost,
        )(x2)

    pooled = out.reshape(-1)[:nc].reshape(n, c)
    if keepdim:
        # F.avg_pool2d with kernel == spatial extent keeps (N, C, 1, 1).
        return pooled.reshape(n, c, 1, 1)
    # torch.flatten(out, 1) -> (N, C)
    return pooled


if __name__ == "__main__":
    key = jax.random.PRNGKey(0)

    # --- Small shape consistent with the module: (batch=2, channels=4, 16x16) ---
    x = jax.random.normal(key, (2, 4, 16, 16), dtype=jnp.float32)
    ref = jnp.mean(x, axis=(2, 3))

    y = jax.block_until_ready(global_avg_pool2d(x, keepdim=False))
    assert y.shape == (2, 4), y.shape
    assert jnp.allclose(y, ref, atol=1e-5, rtol=1e-5)

    y_keep = jax.block_until_ready(global_avg_pool2d(x, keepdim=True))
    assert y_keep.shape == (2, 4, 1, 1), y_keep.shape
    assert jnp.allclose(y_keep[:, :, 0, 0], ref, atol=1e-5, rtol=1e-5)

    # --- Multi-step tiled rows path (grid > 1, non-divisible rows, Buffered(3)) ---
    x2 = jax.random.normal(jax.random.PRNGKey(1), (4, 150, 8, 8), dtype=jnp.float32)
    y2 = jax.block_until_ready(
        global_avg_pool2d(x2, keepdim=False, target_tile_bytes=64 << 10)
    )
    ref2 = jnp.mean(x2, axis=(2, 3))
    assert y2.shape == (4, 150), y2.shape
    assert jnp.allclose(y2, ref2, atol=1e-5, rtol=1e-5)

    # --- HW-tiled accumulator path (small max_tile_bytes forces H*W chunking) ---
    x3 = jax.random.normal(jax.random.PRNGKey(3), (2, 3, 32, 45), dtype=jnp.float32)
    y3 = jax.block_until_ready(
        global_avg_pool2d(x3, keepdim=False, max_tile_bytes=16 << 10)
    )
    ref3 = jnp.mean(x3, axis=(2, 3))
    assert y3.shape == (2, 3), y3.shape
    assert jnp.allclose(y3, ref3, atol=1e-4, rtol=1e-4)

    # --- bf16 input: f32 accumulation inside the kernel, bf16 output ---
    xb = jax.random.normal(jax.random.PRNGKey(2), (2, 4, 16, 16), dtype=jnp.bfloat16)
    yb = jax.block_until_ready(global_avg_pool2d(xb, keepdim=False))
    refb = jnp.mean(xb.astype(jnp.float32), axis=(2, 3))
    assert yb.shape == (2, 4), yb.shape
    assert jnp.allclose(yb.astype(jnp.float32), refb, atol=1e-2, rtol=1e-2)

    print("KERNEL_OK")
</pallas_src>

<mosaic_0001>
module attributes {stable_mosaic.version = 11 : i64} {
  func.func @kernel(%arg0: i32, %arg1: memref<8x256xf32, #tpu.memory_space<vmem>>, %arg2: memref<1x8xf32, #tpu.memory_space<vmem>>) attributes {dimension_semantics = [#tpu.dimension_semantics<parallel>], iteration_bounds = array<i64: 1>, scalar_prefetch = 0 : i64, scratch_operands = 0 : i64, tpu.core_type = #tpu.core_type<tc>, window_params = [{transform_indices = @transform_0, window_bounds = array<i64: 8, 256>}, {transform_indices = @transform_1, window_bounds = array<i64: 1, 8>}]} {
    %c0 = arith.constant 0 : index
    %c0_0 = arith.constant 0 : index
    %0 = vector.load %arg1[%c0, %c0_0] : memref<8x256xf32, #tpu.memory_space<vmem>>, vector<8x256xf32>
    %cst = arith.constant dense<0.000000e+00> : vector<8xf32>
    %1 = vector.multi_reduction <add>, %0, %cst [1] : vector<8x256xf32> to vector<8xf32>
    %cst_1 = arith.constant 3.906250e-03 : f32
    %2 = vector.broadcast %cst_1 : f32 to vector<8xf32>
    %3 = arith.mulf %1, %2 : vector<8xf32>
    %4 = vector.shape_cast %3 : vector<8xf32> to vector<1x8xf32>
    %c0_2 = arith.constant 0 : index
    %c0_3 = arith.constant 0 : index
    %5 = vector.load %arg2[%c0_2, %c0_3] : memref<1x8xf32, #tpu.memory_space<vmem>>, vector<1x8xf32>
    tpu.vector_store %arg2[%c0_2, %c0_3], %4 {strides = array<i32>} : memref<1x8xf32, #tpu.memory_space<vmem>>, vector<1x8xf32>,
    return
  }
  func.func @transform_0(%arg0: i32) -> (i32, i32) {
    %c0_i32 = arith.constant 0 : i32
    %c0_i32_0 = arith.constant 0 : i32
    return %arg0, %c0_i32 : i32, i32
  }
  func.func @transform_1(%arg0: i32) -> (i32, i32) {
    %c0_i32 = arith.constant 0 : i32
    %c0_i32_0 = arith.constant 0 : i32
    return %arg0, %c0_i32 : i32, i32
  }
}

</mosaic_0001>

<bundles_post_ra>
// kernel: tpu_custom_call.1
= control target key start
LH: loop header
LB: loop body
LE: loop exit
PB: predicated region body
PF: predicated region fallthrough
CT: control target
= control target key end

     0   :  { %6 = vsyncpa [#allocation3], 0  ;;  %s116_s0 = inlined_call_operand.hbm [shape: f32[8,256], index: 0, kind: input, shape index: {}]   ;;  %s117_s1 = inlined_call_operand.hbm [shape: f32[1,8], index: 1, kind: output, shape index: {}]  }
   0x1   :  { %7 = vsyncpa [#allocation4], 0  ;;  %s98_s6 = smov [#allocation2]  }
   0x2   :  { %s14_s7 = sshll.u32 %s98_s6, 4  ;;  %s15_s7 = int_to_ptr.vmem [resolvable:$true] %s14_s7 }
   0x3   :  { %s62_s8 = scalar_lea.vmem %s15_s7, 256  ;;  %p67_p1 = scmp.lt.s32.totalorder %s15_s7, %s15_s7 }
   0x4   :  { %p63_p0 = scmp.ne.s32.totalorder %s15_s7, %s62_s8  ;;  %p68_p2 = scmp.lt.s32.totalorder %s62_s8, %s62_s8 }
   0x6   :  { %p69_p3 = por %p68_p2, %p67_p1 }
   0x8   :  { %p70_p4 = pnand %p69_p3, %p63_p0 }
   0xa   :  { %73 = shalt.err (!%p70_p4)
}
   0xb   :  { %17 = dma.hbm_to_vmem [thread:$0]  %s116_s0, 256, %s15_s7, [#allocation3]  }
   0xc   :  { %94 = dma.done.wait [#allocation3], 256  }
   0xd   :  { %95 = vsyncadd [#allocation3], 4294967040  ;;  %v21_v0 = vld [vmem:[#allocation2] sm:$0xff]  ;;  %v22_v1 = vld [vmem:[#allocation2 + $0x8] sm:$0xff]  ;;  %v28_v3 = vlaneseq  ;;  %s99_s11 = smov [#allocation5]   ;;  %vm35_vm0 = vcmask 57344  }
   0xe   :  { %v23_v2 = vadd.f32 %v22_v1, %v21_v0  ;;  %s43_s12 = sshll.u32 %s99_s11, 4  ;;  %s44_s12 = int_to_ptr.vmem [resolvable:$true] %s43_s12 }
   0xf   :  { %v29_v4 = vand.u32 127, %v28_v3  ;;  %v31_v5 = vshrl.u32 %v28_v3, 7  ;;  %s74_s13 = scalar_lea.vmem %s44_s12, 16  ;;  %s78_s0 = scalar_lea.vmem %s44_s12, 32 }
  0x10   :  { %24 = vadd.xlane.f32.xlu0 %v23_v2  ;;  %p75_p5 = scmp.ne.s32.totalorder %s44_s12, %s74_s13  ;;  %p79_p6 = scmp.lt.s32.totalorder %s44_s12, %s44_s12 }
  0x11   :  { %v32_v6 = vsub.s32 %v29_v4, %v31_v5  ;;  %p80_p7 = scmp.lt.s32.totalorder %s78_s0, %s74_s13 }
  0x13   :  { %p81_p8 = por %p80_p7, %p79_p6 }
  0x15   :  { %p82_p9 = pnand %p81_p8, %p75_p5 }
  0x99   :  { %v25_v7 = vpop.xlane.xlu0 %24 }
  0x9a   :  { %v26_v8 = vmul.f32 0.00390625, %v25_v7 }
  0x9c   :  { %v33_v9 = vrot.slane %v26_v8, %v32_v6 }
  0x9e   :  { %36 = vst.msk [vmem:[#allocation5] sm:$0x1] %vm35_vm0, %v33_v9 }
  0x9f   :  { %85 = shalt.err (!%p82_p9)
}
  0xa0   :  { %46 = dma.vmem_to_hbm [thread:$0]  %s44_s12, 16, %s117_s1, [#allocation4]  }
  0xa1   :  { %96 = dma.done.wait [#allocation4], 16  }
  0xa2   :  { %97 = vsyncadd [#allocation4], 4294967280 }
  0xa3   :  { %50 = vsyncpa [#allocation3], 1 }
  0xa4   :  { %51 = vsyncpa [#allocation4], 1 }

</bundles_post_ra>
